<compile_context>
chip_gen: v6e
topology: v6e:2x2x1
jax: 0.10.0
libtpu: 0.0.40
codegen_flags: <defaults>
</compile_context>

<pallas_src>
import functools

import numpy as np

import jax
import jax.numpy as jnp
from jax import lax
from jax.experimental import pallas as pl
from jax.experimental.pallas import tpu as pltpu


# ---------------------------------------------------------------------------
# Fused kernel: conv1 + BN1 + ReLU  (cached per temporal tap, once per n)
#               + depthwise temporal conv2 + BN2 + ReLU
#               + MaxPool3d(1,3,3)/(1,2,2)/(0,1,1)  (whole-slab shifted maxes)
#
# Refs (per grid step (n, t2)):
#   xt_ref : (1, T1, K, M2)   all conv1 im2col taps of sample n (resident
#                             across the whole T2 sweep; K = C_in*kh*kw on
#                             sublanes, M2 = H2*W2 on lanes with rows and
#                             columns each packed [even | odd]).
#   w1_ref : (C_out, K)       conv1 weights (resident).
#   s1/b1  : (C_out, 1)       folded BN1 scale / bias.
#   w2_ref : (kt, C_out, 1)   depthwise temporal conv2 weights (resident).
#   s2/b2  : (C_out, 1)       folded BN2 scale / bias.
#   m_ref  : (3, M2)          per-lane 0/1 pooling-validity masks (resident).
#   o_ref  : (1, C_out, HW_store) pooled output block for (n, t2).
#   y1_ref : (T1, C_out, M2)  f32 VMEM cache of conv1+BN1+ReLU per tap.
# ---------------------------------------------------------------------------
def _fused_stem_kernel(xt_ref, w1_ref, s1_ref, b1_ref, w2_ref, s2_ref, b2_ref,
                       m_ref, o_ref, y1_ref, *,
                       st, pt, T1, kt, H2, W2, H3, W3, HW_store):
    t2 = pl.program_id(1)
    M2 = H2 * W2
    C = y1_ref.shape[1]

    # --- Phase 1 (once per sample n): conv1 + BN1 + ReLU for every tap. -----
    @pl.when(t2 == 0)
    def _fill_y1_cache():
        for t1 in range(T1):                       # static unroll (T1 small)
            xblk = xt_ref[0, t1]                   # (K, M2)
            y1 = jnp.dot(w1_ref[...], xblk,
                         preferred_element_type=jnp.float32)      # (C, M2)
            y1 = jnp.maximum(y1 * s1_ref[...] + b1_ref[...], 0.0)  # BN1+ReLU
            y1_ref[t1] = y1

    # --- Phase 2: depthwise temporal conv2 (weighted sum over cached taps). -
    acc = jnp.zeros((C, M2), jnp.float32)
    for k in range(kt):                            # kt is small & static
        t1 = t2 * st - pt + k
        valid = jnp.logical_and(t1 >= 0, t1 < T1)  # conv2 zero-pads y1, not x
        t1c = jnp.clip(t1, 0, T1 - 1)
        wk = w2_ref[k] * valid.astype(jnp.float32)  # (C, 1), zeroed if padded
        acc = acc + y1_ref[t1c] * wk

    # --- BN2 + ReLU (values are now >= 0, so 0 is the max-pool identity). ---
    y2 = jnp.maximum(acc * s2_ref[...] + b2_ref[...], 0.0)        # (C, M2)

    # --- MaxPool (1,3,3)/(1,2,2)/(0,1,1): whole-slab shifted-slice maxes. ---
    # Lane layout: lane = r*W2 + c with rows r packed [even h2 | odd h2] and
    # columns c packed [even w2 | odd w2].  Pool result for (h3, w3) lands at
    # lane h3*W2 + w3 (r < H3, c < W3).
    def shift_left(x, k):
        if k <= 0:
            return x
        if k >= M2:
            return jnp.zeros_like(x)
        return jnp.concatenate(
            [x[:, k:], jnp.zeros((x.shape[0], k), x.dtype)], axis=1)

    m_odd_same = m_ref[0:1, :]   # c < W2 - W3 : odd column 2c+1 exists
    m_odd_prev = m_ref[1:2, :]   # c >= 1      : odd column 2c-1 exists
    m_row_prev = m_ref[2:3, :]   # r >= 1      : odd row 2r-1 exists

    # Horizontal window {2c-1, 2c, 2c+1}.
    hmax = jnp.maximum(
        y2,
        jnp.maximum(shift_left(y2, W3) * m_odd_same,
                    shift_left(y2, W3 - 1) * m_odd_prev))
    # Vertical window {2r-1, 2r, 2r+1}.  The "+1" shift needs no mask: when
    # the odd row below does not exist the shift's zero-fill already covers it.
    vmax = jnp.maximum(
        hmax,
        jnp.maximum(shift_left(hmax, H3 * W2),
                    shift_left(hmax, (H3 - 1) * W2) * m_row_prev))

    res = vmax[:, :H3 * W2]                        # valid at c < W3 per row
    pad = HW_store - H3 * W2
    if pad > 0:
        res = jnp.concatenate(
            [res, jnp.zeros((res.shape[0], pad), res.dtype)], axis=1)
    o_ref[0] = res.astype(o_ref.dtype)             # one dense (lane-padded) store


# ---------------------------------------------------------------------------
# Forward pass (Pallas path).  External layout is PyTorch NCTHW.
# ---------------------------------------------------------------------------
def x3d_basic_stem_forward(x, params, *, kernel, stride, padding, eps=1e-5,
                           compute_dtype=jnp.bfloat16):
    kt, kh, kw = kernel
    st, sh, sw = stride
    pt, ph, pw = padding
    w1 = params["w1"]                         # (C_out, C_in, 1, kh, kw)
    w2 = params["w2"]                         # (C_out, 1, kt, 1, 1)
    C_out = w1.shape[0]
    N, C_in, T, H, W = x.shape

    # Derived sizes (PyTorch floor conventions; both convs use the full stride,
    # exactly as in the given module spec).
    T1 = (T - 1) // st + 1
    H1 = (H + 2 * ph - kh) // sh + 1
    W1 = (W + 2 * pw - kw) // sw + 1
    T2 = (T1 + 2 * pt - kt) // st + 1
    H2 = (H1 - 1) // sh + 1
    W2 = (W1 - 1) // sw + 1
    H3 = (H2 - 1) // 2 + 1                    # MaxPool3d (1,3,3)/(1,2,2)/(0,1,1)
    W3 = (W2 - 1) // 2 + 1
    s2h, s2w = sh * sh, sw * sw               # combined conv1*conv2 spatial stride
    K = C_in * kh * kw
    M2 = H2 * W2
    HW_store = ((H3 * W2 + 127) // 128) * 128  # lane-padded store width

    # Fold BN (inference mode) into per-channel scale/bias.
    def fold(g, b, m, v):
        s = (g / jnp.sqrt(v + eps)).astype(jnp.float32)
        return s.reshape(C_out, 1), (b - m * s).astype(jnp.float32).reshape(C_out, 1)

    scale1, bias1 = fold(params["bn1_gamma"], params["bn1_beta"],
                         params["bn1_mean"], params["bn1_var"])
    scale2, bias2 = fold(params["bn2_gamma"], params["bn2_beta"],
                         params["bn2_mean"], params["bn2_var"])

    # ---- conv1 tap stack, decimated to the positions conv2/pool consume.
    # For the canonical X3D stride [1,2,2] this is smaller than the input
    # (kh*kw / (sh^2*sw^2) = 9/16) and (bf16) half the bytes again.
    x_t = x[:, :, ::st, :, :]                                  # (N, C_in, T1, H, W)
    x_sp = jnp.pad(x_t, ((0, 0), (0, 0), (0, 0), (ph, ph), (pw, pw)))
    taps = []
    for dh in range(kh):
        for dw in range(kw):
            taps.append(x_sp[:, :, :,
                             dh:dh + (H2 - 1) * s2h + 1:s2h,
                             dw:dw + (W2 - 1) * s2w + 1:s2w])  # (N,C_in,T1,H2,W2)
    xt = jnp.stack(taps, axis=3)                               # (N,C_in,T1,khkw,H2,W2)
    xt = xt.transpose(0, 2, 1, 3, 4, 5)                        # (N,T1,C_in,khkw,H2,W2)
    # Pack rows (H2) and columns (W2) [even | odd] so the stride-2 pool becomes
    # contiguous shifted-slab maxes inside the kernel.
    xt = jnp.concatenate([xt[..., 0::2, :], xt[..., 1::2, :]], axis=-2)
    xt = jnp.concatenate([xt[..., 0::2], xt[..., 1::2]], axis=-1)
    xt = xt.reshape(N, T1, K, M2).astype(compute_dtype)        # (N, T1, K, M2)

    w1_mat = w1.reshape(C_out, K).astype(compute_dtype)        # matches xt K order
    w2_taps = w2.reshape(C_out, kt).T.reshape(kt, C_out, 1).astype(jnp.float32)

    # Per-lane 0/1 pooling-validity masks (constant, resident in VMEM).
    lane = np.arange(M2)
    cpos = lane % W2
    row = lane // W2
    masks = jnp.asarray(np.stack([
        (cpos < (W2 - W3)).astype(np.float32),   # odd column 2c+1 exists
        (cpos >= 1).astype(np.float32),          # odd column 2c-1 exists
        (row >= 1).astype(np.float32),           # odd row 2r-1 exists
    ], axis=0))                                  # (3, M2)

    kern = functools.partial(_fused_stem_kernel,
                             st=st, pt=pt, T1=T1, kt=kt,
                             H2=H2, W2=W2, H3=H3, W3=W3, HW_store=HW_store)

    out = pl.pallas_call(
        kern,
        out_shape=jax.ShapeDtypeStruct((N, C_out, T2 * HW_store), jnp.float32),
        grid_spec=pltpu.PrefetchScalarGridSpec(
            num_scalar_prefetch=0,
            grid=(N, T2),
            in_specs=[
                # Whole per-sample tap stack: constant block index along T2 ->
                # DMA'd from HBM exactly once per n, resident across the sweep.
                pl.BlockSpec((1, T1, K, M2), lambda n, t: (n, 0, 0, 0)),
                pl.BlockSpec((C_out, K), lambda n, t: (0, 0)),
                pl.BlockSpec((C_out, 1), lambda n, t: (0, 0)),
                pl.BlockSpec((C_out, 1), lambda n, t: (0, 0)),
                pl.BlockSpec((kt, C_out, 1), lambda n, t: (0, 0, 0)),
                pl.BlockSpec((C_out, 1), lambda n, t: (0, 0)),
                pl.BlockSpec((C_out, 1), lambda n, t: (0, 0)),
                pl.BlockSpec((3, M2), lambda n, t: (0, 0)),
            ],
            # Direct (N, C_out, T2*HW_store) layout: lane-dense, 128-aligned,
            # unmasked stores; no output transpose in the wrapper.
            out_specs=pl.BlockSpec((1, C_out, HW_store), lambda n, t: (n, 0, t)),
            scratch_shapes=[pltpu.VMEM((T1, C_out, M2), jnp.float32)],
        ),
        compiler_params=pltpu.CompilerParams(
            dimension_semantics=("parallel", "arbitrary"),
            vmem_limit_bytes=48 * 1024 * 1024,
        ),
    )(xt, w1_mat, scale1, bias1, w2_taps, scale2, bias2, masks)

    # Crop the pooling / lane padding (slices only, no transpose): final NCTHW.
    out = out.reshape(N, C_out, T2, HW_store)[:, :, :, :H3 * W2]
    out = out.reshape(N, C_out, T2, H3, W2)[:, :, :, :, :W3]
    return out


# ---------------------------------------------------------------------------
# Pure-JAX reference (verification only) — matches the given module spec.
# ---------------------------------------------------------------------------
def x3d_basic_stem_reference(x, params, *, kernel, stride, padding, eps=1e-5):
    kt, kh, kw = kernel
    st, sh, sw = stride
    pt, ph, pw = padding
    w1, w2 = params["w1"], params["w2"]
    C_out = w1.shape[0]

    def bn(y, g, b, m, v):
        sp = (1, -1, 1, 1, 1)
        return (y - m.reshape(sp)) / jnp.sqrt(v.reshape(sp) + eps) * g.reshape(sp) + b.reshape(sp)

    y = lax.conv_general_dilated(
        x, w1, window_strides=(st, sh, sw),
        padding=((0, 0), (ph, ph), (pw, pw)),
        dimension_numbers=("NCDHW", "OIDHW", "NCDHW"),
        precision=lax.Precision.HIGHEST)
    y = jnp.maximum(bn(y, params["bn1_gamma"], params["bn1_beta"],
                       params["bn1_mean"], params["bn1_var"]), 0.0)
    y = lax.conv_general_dilated(
        y, w2, window_strides=(st, sh, sw),
        padding=((pt, pt), (0, 0), (0, 0)),
        dimension_numbers=("NCDHW", "OIDHW", "NCDHW"),
        feature_group_count=C_out,
        precision=lax.Precision.HIGHEST)
    y = jnp.maximum(bn(y, params["bn2_gamma"], params["bn2_beta"],
                       params["bn2_mean"], params["bn2_var"]), 0.0)
    y = lax.reduce_window(
        y, -jnp.inf, lax.max,
        window_dimensions=(1, 1, 1, 3, 3),
        window_strides=(1, 1, 1, 2, 2),
        padding=((0, 0), (0, 0), (0, 0), (1, 1), (1, 1)))
    return y


if __name__ == "__main__":
    key = jax.random.PRNGKey(0)
    kx, kw1, kw2 = jax.random.split(key, 3)

    # Small X3D-style config: dim_in=3, dim_out=8, kernel [5,3,3],
    # stride [1,2,2], padding [2,1,1].
    N, C_in, T, H, W = 2, 3, 4, 16, 16
    C_out = 8
    kernel = [5, 3, 3]
    stride = [1, 2, 2]
    padding = [2, 1, 1]

    x = jax.random.normal(kx, (N, C_in, T, H, W), jnp.float32)
    params = dict(
        w1=0.1 * jax.random.normal(kw1, (C_out, C_in, 1, kernel[1], kernel[2]), jnp.float32),
        w2=0.1 * jax.random.normal(kw2, (C_out, 1, kernel[0], 1, 1), jnp.float32),
        bn1_gamma=1.0 + 0.05 * jnp.arange(C_out, dtype=jnp.float32),
        bn1_beta=0.02 * jnp.arange(C_out, dtype=jnp.float32),
        bn1_mean=0.01 * jnp.arange(C_out, dtype=jnp.float32),
        bn1_var=1.0 + 0.03 * jnp.arange(C_out, dtype=jnp.float32),
        bn2_gamma=1.0 - 0.02 * jnp.arange(C_out, dtype=jnp.float32),
        bn2_beta=-0.01 * jnp.arange(C_out, dtype=jnp.float32),
        bn2_mean=0.02 * jnp.arange(C_out, dtype=jnp.float32),
        bn2_var=1.0 + 0.04 * jnp.arange(C_out, dtype=jnp.float32),
    )

    ref = x3d_basic_stem_reference(x, params, kernel=kernel, stride=stride,
                                   padding=padding)

    # f32 path: tight correctness check against the pure-JAX reference.
    fwd_f32 = jax.jit(lambda xx, pp: x3d_basic_stem_forward(
        xx, pp, kernel=kernel, stride=stride, padding=padding,
        compute_dtype=jnp.float32))
    out32 = jax.block_until_ready(fwd_f32(x, params))
    assert out32.shape == ref.shape, (out32.shape, ref.shape)
    err32 = float(jnp.max(jnp.abs(out32 - ref)))
    assert jnp.allclose(out32, ref, atol=5e-4, rtol=5e-4), err32

    # bf16 path (default / recommended on v5e & v6e): looser tolerance.
    fwd_bf16 = jax.jit(lambda xx, pp: x3d_basic_stem_forward(
        xx, pp, kernel=kernel, stride=stride, padding=padding,
        compute_dtype=jnp.bfloat16))
    outbf = jax.block_until_ready(fwd_bf16(x, params))
    errbf = float(jnp.max(jnp.abs(outbf - ref)))
    assert jnp.allclose(outbf, ref, atol=3e-2, rtol=3e-2), errbf

    print("KERNEL_OK")
</pallas_src>

<mosaic_0001>
module attributes {stable_mosaic.version = 11 : i64} {
  func.func @_fused_stem_kernel(%arg0: i32, %arg1: i32, %arg2: memref<1x4x27x16xf32, #tpu.memory_space<vmem>>, %arg3: memref<8x27xf32, #tpu.memory_space<vmem>>, %arg4: memref<8x1xf32, #tpu.memory_space<vmem>>, %arg5: memref<8x1xf32, #tpu.memory_space<vmem>>, %arg6: memref<5x8x1xf32, #tpu.memory_space<vmem>>, %arg7: memref<8x1xf32, #tpu.memory_space<vmem>>, %arg8: memref<8x1xf32, #tpu.memory_space<vmem>>, %arg9: memref<3x16xf32, #tpu.memory_space<vmem>>, %arg10: memref<1x8x128xf32, #tpu.memory_space<vmem>>, %arg11: memref<4x8x16xf32, #tpu.memory_space<vmem>>) attributes {dimension_semantics = [#tpu.dimension_semantics<parallel>, #tpu.dimension_semantics<arbitrary>], iteration_bounds = array<i64: 2, 4>, scalar_prefetch = 0 : i64, scratch_operands = 1 : i64, tpu.core_type = #tpu.core_type<tc>, window_params = [{transform_indices = @transform_0, window_bounds = array<i64: 1, 4, 27, 16>}, {pipeline_mode = #tpu.pipeline_mode<synchronous>, transform_indices = @transform_1, window_bounds = array<i64: 8, 27>}, {pipeline_mode = #tpu.pipeline_mode<synchronous>, transform_indices = @transform_2, window_bounds = array<i64: 8, 1>}, {pipeline_mode = #tpu.pipeline_mode<synchronous>, transform_indices = @transform_3, window_bounds = array<i64: 8, 1>}, {pipeline_mode = #tpu.pipeline_mode<synchronous>, transform_indices = @transform_4, window_bounds = array<i64: 5, 8, 1>}, {pipeline_mode = #tpu.pipeline_mode<synchronous>, transform_indices = @transform_5, window_bounds = array<i64: 8, 1>}, {pipeline_mode = #tpu.pipeline_mode<synchronous>, transform_indices = @transform_6, window_bounds = array<i64: 8, 1>}, {pipeline_mode = #tpu.pipeline_mode<synchronous>, transform_indices = @transform_7, window_bounds = array<i64: 3, 16>}, {transform_indices = @transform_8, window_bounds = array<i64: 1, 8, 128>}]} {
    %c0_i32 = arith.constant 0 : i32
    %0 = arith.cmpi eq, %arg1, %c0_i32 : i32
    %1 = arith.extui %0 : i1 to i32
    %c0_i32_0 = arith.constant 0 : i32
    %2 = arith.cmpi ne, %1, %c0_i32_0 : i32
    scf.if %2 {
      %c0_71 = arith.constant 0 : index
      %c0_72 = arith.constant 0 : index
      %c0_73 = arith.constant 0 : index
      %c0_74 = arith.constant 0 : index
      %143 = vector.load %arg2[%c0_71, %c0_72, %c0_73, %c0_74] : memref<1x4x27x16xf32, #tpu.memory_space<vmem>>, vector<1x1x27x16xf32>
      %144 = vector.shape_cast %143 : vector<1x1x27x16xf32> to vector<27x16xf32>
      %c0_75 = arith.constant 0 : index
      %c0_76 = arith.constant 0 : index
      %145 = vector.load %arg3[%c0_75, %c0_76] : memref<8x27xf32, #tpu.memory_space<vmem>>, vector<8x27xf32>
      %cst_77 = arith.constant dense<0.000000e+00> : vector<8x16xf32>
      %146 = tpu.matmul %145, %144, %cst_77 {dimension_numbers = #tpu.dot_dimension_numbers<[1], [0], [0], [1], [0, 0, 1, 1], [], []>} : vector<8x27xf32>, vector<27x16xf32>, vector<8x16xf32> -> vector<8x16xf32>
      %c0_78 = arith.constant 0 : index
      %c0_79 = arith.constant 0 : index
      %147 = vector.load %arg4[%c0_78, %c0_79] : memref<8x1xf32, #tpu.memory_space<vmem>>, vector<8x1xf32>
      %148 = vector.broadcast %147 : vector<8x1xf32> to vector<8x16xf32>
      %149 = arith.mulf %146, %148 : vector<8x16xf32>
      %c0_80 = arith.constant 0 : index
      %c0_81 = arith.constant 0 : index
      %150 = vector.load %arg5[%c0_80, %c0_81] : memref<8x1xf32, #tpu.memory_space<vmem>>, vector<8x1xf32>
      %151 = vector.broadcast %150 : vector<8x1xf32> to vector<8x16xf32>
      %152 = arith.addf %149, %151 : vector<8x16xf32>
      %cst_82 = arith.constant 0.000000e+00 : f32
      %153 = vector.broadcast %cst_82 : f32 to vector<8x16xf32>
      %154 = arith.maximumf %152, %153 : vector<8x16xf32>
      %c0_83 = arith.constant 0 : index
      %c0_84 = arith.constant 0 : index
      %c0_85 = arith.constant 0 : index
      %155 = vector.load %arg11[%c0_83, %c0_84, %c0_85] : memref<4x8x16xf32, #tpu.memory_space<vmem>>, vector<1x8x16xf32>
      %156 = vector.shape_cast %155 : vector<1x8x16xf32> to vector<8x16xf32>
      %157 = vector.shape_cast %154 : vector<8x16xf32> to vector<1x8x16xf32>
      tpu.vector_store %arg11[%c0_83, %c0_84, %c0_85], %157 {strides = array<i32>} : memref<4x8x16xf32, #tpu.memory_space<vmem>>, vector<1x8x16xf32>,
      %c0_86 = arith.constant 0 : index
      %c1_87 = arith.constant 1 : index
      %c0_88 = arith.constant 0 : index
      %c0_89 = arith.constant 0 : index
      %158 = vector.load %arg2[%c0_86, %c1_87, %c0_88, %c0_89] : memref<1x4x27x16xf32, #tpu.memory_space<vmem>>, vector<1x1x27x16xf32>
      %159 = vector.shape_cast %158 : vector<1x1x27x16xf32> to vector<27x16xf32>
      %c0_90 = arith.constant 0 : index
      %c0_91 = arith.constant 0 : index
      %160 = vector.load %arg3[%c0_90, %c0_91] : memref<8x27xf32, #tpu.memory_space<vmem>>, vector<8x27xf32>
      %cst_92 = arith.constant dense<0.000000e+00> : vector<8x16xf32>
      %161 = tpu.matmul %160, %159, %cst_92 {dimension_numbers = #tpu.dot_dimension_numbers<[1], [0], [0], [1], [0, 0, 1, 1], [], []>} : vector<8x27xf32>, vector<27x16xf32>, vector<8x16xf32> -> vector<8x16xf32>
      %c0_93 = arith.constant 0 : index
      %c0_94 = arith.constant 0 : index
      %162 = vector.load %arg4[%c0_93, %c0_94] : memref<8x1xf32, #tpu.memory_space<vmem>>, vector<8x1xf32>
      %163 = vector.broadcast %162 : vector<8x1xf32> to vector<8x16xf32>
      %164 = arith.mulf %161, %163 : vector<8x16xf32>
      %c0_95 = arith.constant 0 : index
      %c0_96 = arith.constant 0 : index
      %165 = vector.load %arg5[%c0_95, %c0_96] : memref<8x1xf32, #tpu.memory_space<vmem>>, vector<8x1xf32>
      %166 = vector.broadcast %165 : vector<8x1xf32> to vector<8x16xf32>
      %167 = arith.addf %164, %166 : vector<8x16xf32>
      %cst_97 = arith.constant 0.000000e+00 : f32
      %168 = vector.broadcast %cst_97 : f32 to vector<8x16xf32>
      %169 = arith.maximumf %167, %168 : vector<8x16xf32>
      %c1_98 = arith.constant 1 : index
      %c0_99 = arith.constant 0 : index
      %c0_100 = arith.constant 0 : index
      %170 = vector.load %arg11[%c1_98, %c0_99, %c0_100] : memref<4x8x16xf32, #tpu.memory_space<vmem>>, vector<1x8x16xf32>
      %171 = vector.shape_cast %170 : vector<1x8x16xf32> to vector<8x16xf32>
      %172 = vector.shape_cast %169 : vector<8x16xf32> to vector<1x8x16xf32>
      tpu.vector_store %arg11[%c1_98, %c0_99, %c0_100], %172 {strides = array<i32>} : memref<4x8x16xf32, #tpu.memory_space<vmem>>, vector<1x8x16xf32>,
      %c0_101 = arith.constant 0 : index
      %c2_102 = arith.constant 2 : index
      %c0_103 = arith.constant 0 : index
      %c0_104 = arith.constant 0 : index
      %173 = vector.load %arg2[%c0_101, %c2_102, %c0_103, %c0_104] : memref<1x4x27x16xf32, #tpu.memory_space<vmem>>, vector<1x1x27x16xf32>
      %174 = vector.shape_cast %173 : vector<1x1x27x16xf32> to vector<27x16xf32>
      %c0_105 = arith.constant 0 : index
      %c0_106 = arith.constant 0 : index
      %175 = vector.load %arg3[%c0_105, %c0_106] : memref<8x27xf32, #tpu.memory_space<vmem>>, vector<8x27xf32>
      %cst_107 = arith.constant dense<0.000000e+00> : vector<8x16xf32>
      %176 = tpu.matmul %175, %174, %cst_107 {dimension_numbers = #tpu.dot_dimension_numbers<[1], [0], [0], [1], [0, 0, 1, 1], [], []>} : vector<8x27xf32>, vector<27x16xf32>, vector<8x16xf32> -> vector<8x16xf32>
      %c0_108 = arith.constant 0 : index
      %c0_109 = arith.constant 0 : index
      %177 = vector.load %arg4[%c0_108, %c0_109] : memref<8x1xf32, #tpu.memory_space<vmem>>, vector<8x1xf32>
      %178 = vector.broadcast %177 : vector<8x1xf32> to vector<8x16xf32>
      %179 = arith.mulf %176, %178 : vector<8x16xf32>
      %c0_110 = arith.constant 0 : index
      %c0_111 = arith.constant 0 : index
      %180 = vector.load %arg5[%c0_110, %c0_111] : memref<8x1xf32, #tpu.memory_space<vmem>>, vector<8x1xf32>
      %181 = vector.broadcast %180 : vector<8x1xf32> to vector<8x16xf32>
      %182 = arith.addf %179, %181 : vector<8x16xf32>
      %cst_112 = arith.constant 0.000000e+00 : f32
      %183 = vector.broadcast %cst_112 : f32 to vector<8x16xf32>
      %184 = arith.maximumf %182, %183 : vector<8x16xf32>
      %c2_113 = arith.constant 2 : index
      %c0_114 = arith.constant 0 : index
      %c0_115 = arith.constant 0 : index
      %185 = vector.load %arg11[%c2_113, %c0_114, %c0_115] : memref<4x8x16xf32, #tpu.memory_space<vmem>>, vector<1x8x16xf32>
      %186 = vector.shape_cast %185 : vector<1x8x16xf32> to vector<8x16xf32>
      %187 = vector.shape_cast %184 : vector<8x16xf32> to vector<1x8x16xf32>
      tpu.vector_store %arg11[%c2_113, %c0_114, %c0_115], %187 {strides = array<i32>} : memref<4x8x16xf32, #tpu.memory_space<vmem>>, vector<1x8x16xf32>,
      %c0_116 = arith.constant 0 : index
      %c3_117 = arith.constant 3 : index
      %c0_118 = arith.constant 0 : index
      %c0_119 = arith.constant 0 : index
      %188 = vector.load %arg2[%c0_116, %c3_117, %c0_118, %c0_119] : memref<1x4x27x16xf32, #tpu.memory_space<vmem>>, vector<1x1x27x16xf32>
      %189 = vector.shape_cast %188 : vector<1x1x27x16xf32> to vector<27x16xf32>
      %c0_120 = arith.constant 0 : index
      %c0_121 = arith.constant 0 : index
      %190 = vector.load %arg3[%c0_120, %c0_121] : memref<8x27xf32, #tpu.memory_space<vmem>>, vector<8x27xf32>
      %cst_122 = arith.constant dense<0.000000e+00> : vector<8x16xf32>
      %191 = tpu.matmul %190, %189, %cst_122 {dimension_numbers = #tpu.dot_dimension_numbers<[1], [0], [0], [1], [0, 0, 1, 1], [], []>} : vector<8x27xf32>, vector<27x16xf32>, vector<8x16xf32> -> vector<8x16xf32>
      %c0_123 = arith.constant 0 : index
      %c0_124 = arith.constant 0 : index
      %192 = vector.load %arg4[%c0_123, %c0_124] : memref<8x1xf32, #tpu.memory_space<vmem>>, vector<8x1xf32>
      %193 = vector.broadcast %192 : vector<8x1xf32> to vector<8x16xf32>
      %194 = arith.mulf %191, %193 : vector<8x16xf32>
      %c0_125 = arith.constant 0 : index
      %c0_126 = arith.constant 0 : index
      %195 = vector.load %arg5[%c0_125, %c0_126] : memref<8x1xf32, #tpu.memory_space<vmem>>, vector<8x1xf32>
      %196 = vector.broadcast %195 : vector<8x1xf32> to vector<8x16xf32>
      %197 = arith.addf %194, %196 : vector<8x16xf32>
      %cst_127 = arith.constant 0.000000e+00 : f32
      %198 = vector.broadcast %cst_127 : f32 to vector<8x16xf32>
      %199 = arith.maximumf %197, %198 : vector<8x16xf32>
      %c3_128 = arith.constant 3 : index
      %c0_129 = arith.constant 0 : index
      %c0_130 = arith.constant 0 : index
      %200 = vector.load %arg11[%c3_128, %c0_129, %c0_130] : memref<4x8x16xf32, #tpu.memory_space<vmem>>, vector<1x8x16xf32>
      %201 = vector.shape_cast %200 : vector<1x8x16xf32> to vector<8x16xf32>
      %202 = vector.shape_cast %199 : vector<8x16xf32> to vector<1x8x16xf32>
      tpu.vector_store %arg11[%c3_128, %c0_129, %c0_130], %202 {strides = array<i32>} : memref<4x8x16xf32, #tpu.memory_space<vmem>>, vector<1x8x16xf32>,
    } else {
    }
    %cst = arith.constant 0.000000e+00 : f32
    %3 = vector.broadcast %cst : f32 to vector<8x16xf32>
    %c1_i32 = arith.constant 1 : i32
    %4 = arith.muli %arg1, %c1_i32 : i32
    %c2_i32 = arith.constant 2 : i32
    %5 = arith.subi %4, %c2_i32 : i32
    %c0_i32_1 = arith.constant 0 : i32
    %6 = arith.addi %5, %c0_i32_1 : i32
    %c0_i32_2 = arith.constant 0 : i32
    %7 = arith.cmpi sge, %6, %c0_i32_2 : i32
    %c4_i32 = arith.constant 4 : i32
    %8 = arith.cmpi slt, %6, %c4_i32 : i32
    %9 = arith.andi %7, %8 : i1
    %c0_i32_3 = arith.constant 0 : i32
    %c3_i32 = arith.constant 3 : i32
    %10 = arith.maxsi %c0_i32_3, %6 : i32
    %11 = arith.minsi %c3_i32, %10 : i32
    %c0 = arith.constant 0 : index
    %c0_4 = arith.constant 0 : index
    %c0_5 = arith.constant 0 : index
    %12 = vector.load %arg6[%c0, %c0_4, %c0_5] : memref<5x8x1xf32, #tpu.memory_space<vmem>>, vector<1x8x1xf32>
    %13 = vector.shape_cast %12 : vector<1x8x1xf32> to vector<8x1xf32>
    %14 = arith.extui %9 : i1 to i32
    %15 = arith.sitofp %14 : i32 to f32
    %16 = vector.broadcast %15 : f32 to vector<8x1xf32>
    %17 = arith.mulf %13, %16 : vector<8x1xf32>
    %18 = arith.index_cast %11 : i32 to index
    %c0_6 = arith.constant 0 : index
    %c0_7 = arith.constant 0 : index
    %19 = vector.load %arg11[%18, %c0_6, %c0_7] : memref<4x8x16xf32, #tpu.memory_space<vmem>>, vector<1x8x16xf32>
    %20 = vector.shape_cast %19 : vector<1x8x16xf32> to vector<8x16xf32>
    %21 = vector.broadcast %17 : vector<8x1xf32> to vector<8x16xf32>
    %22 = arith.mulf %20, %21 : vector<8x16xf32>
    %23 = arith.addf %3, %22 : vector<8x16xf32>
    %c1_i32_8 = arith.constant 1 : i32
    %24 = arith.muli %arg1, %c1_i32_8 : i32
    %c2_i32_9 = arith.constant 2 : i32
    %25 = arith.subi %24, %c2_i32_9 : i32
    %c1_i32_10 = arith.constant 1 : i32
    %26 = arith.addi %25, %c1_i32_10 : i32
    %c0_i32_11 = arith.constant 0 : i32
    %27 = arith.cmpi sge, %26, %c0_i32_11 : i32
    %c4_i32_12 = arith.constant 4 : i32
    %28 = arith.cmpi slt, %26, %c4_i32_12 : i32
    %29 = arith.andi %27, %28 : i1
    %c0_i32_13 = arith.constant 0 : i32
    %c3_i32_14 = arith.constant 3 : i32
    %30 = arith.maxsi %c0_i32_13, %26 : i32
    %31 = arith.minsi %c3_i32_14, %30 : i32
    %c1 = arith.constant 1 : index
    %c0_15 = arith.constant 0 : index
    %c0_16 = arith.constant 0 : index
    %32 = vector.load %arg6[%c1, %c0_15, %c0_16] : memref<5x8x1xf32, #tpu.memory_space<vmem>>, vector<1x8x1xf32>
    %33 = vector.shape_cast %32 : vector<1x8x1xf32> to vector<8x1xf32>
    %34 = arith.extui %29 : i1 to i32
    %35 = arith.sitofp %34 : i32 to f32
    %36 = vector.broadcast %35 : f32 to vector<8x1xf32>
    %37 = arith.mulf %33, %36 : vector<8x1xf32>
    %38 = arith.index_cast %31 : i32 to index
    %c0_17 = arith.constant 0 : index
    %c0_18 = arith.constant 0 : index
    %39 = vector.load %arg11[%38, %c0_17, %c0_18] : memref<4x8x16xf32, #tpu.memory_space<vmem>>, vector<1x8x16xf32>
    %40 = vector.shape_cast %39 : vector<1x8x16xf32> to vector<8x16xf32>
    %41 = vector.broadcast %37 : vector<8x1xf32> to vector<8x16xf32>
    %42 = arith.mulf %40, %41 : vector<8x16xf32>
    %43 = arith.addf %23, %42 : vector<8x16xf32>
    %c1_i32_19 = arith.constant 1 : i32
    %44 = arith.muli %arg1, %c1_i32_19 : i32
    %c2_i32_20 = arith.constant 2 : i32
    %45 = arith.subi %44, %c2_i32_20 : i32
    %c2_i32_21 = arith.constant 2 : i32
    %46 = arith.addi %45, %c2_i32_21 : i32
    %c0_i32_22 = arith.constant 0 : i32
    %47 = arith.cmpi sge, %46, %c0_i32_22 : i32
    %c4_i32_23 = arith.constant 4 : i32
    %48 = arith.cmpi slt, %46, %c4_i32_23 : i32
    %49 = arith.andi %47, %48 : i1
    %c0_i32_24 = arith.constant 0 : i32
    %c3_i32_25 = arith.constant 3 : i32
    %50 = arith.maxsi %c0_i32_24, %46 : i32
    %51 = arith.minsi %c3_i32_25, %50 : i32
    %c2 = arith.constant 2 : index
    %c0_26 = arith.constant 0 : index
    %c0_27 = arith.constant 0 : index
    %52 = vector.load %arg6[%c2, %c0_26, %c0_27] : memref<5x8x1xf32, #tpu.memory_space<vmem>>, vector<1x8x1xf32>
    %53 = vector.shape_cast %52 : vector<1x8x1xf32> to vector<8x1xf32>
    %54 = arith.extui %49 : i1 to i32
    %55 = arith.sitofp %54 : i32 to f32
    %56 = vector.broadcast %55 : f32 to vector<8x1xf32>
    %57 = arith.mulf %53, %56 : vector<8x1xf32>
    %58 = arith.index_cast %51 : i32 to index
    %c0_28 = arith.constant 0 : index
    %c0_29 = arith.constant 0 : index
    %59 = vector.load %arg11[%58, %c0_28, %c0_29] : memref<4x8x16xf32, #tpu.memory_space<vmem>>, vector<1x8x16xf32>
    %60 = vector.shape_cast %59 : vector<1x8x16xf32> to vector<8x16xf32>
    %61 = vector.broadcast %57 : vector<8x1xf32> to vector<8x16xf32>
    %62 = arith.mulf %60, %61 : vector<8x16xf32>
    %63 = arith.addf %43, %62 : vector<8x16xf32>
    %c1_i32_30 = arith.constant 1 : i32
    %64 = arith.muli %arg1, %c1_i32_30 : i32
    %c2_i32_31 = arith.constant 2 : i32
    %65 = arith.subi %64, %c2_i32_31 : i32
    %c3_i32_32 = arith.constant 3 : i32
    %66 = arith.addi %65, %c3_i32_32 : i32
    %c0_i32_33 = arith.constant 0 : i32
    %67 = arith.cmpi sge, %66, %c0_i32_33 : i32
    %c4_i32_34 = arith.constant 4 : i32
    %68 = arith.cmpi slt, %66, %c4_i32_34 : i32
    %69 = arith.andi %67, %68 : i1
    %c0_i32_35 = arith.constant 0 : i32
    %c3_i32_36 = arith.constant 3 : i32
    %70 = arith.maxsi %c0_i32_35, %66 : i32
    %71 = arith.minsi %c3_i32_36, %70 : i32
    %c3 = arith.constant 3 : index
    %c0_37 = arith.constant 0 : index
    %c0_38 = arith.constant 0 : index
    %72 = vector.load %arg6[%c3, %c0_37, %c0_38] : memref<5x8x1xf32, #tpu.memory_space<vmem>>, vector<1x8x1xf32>
    %73 = vector.shape_cast %72 : vector<1x8x1xf32> to vector<8x1xf32>
    %74 = arith.extui %69 : i1 to i32
    %75 = arith.sitofp %74 : i32 to f32
    %76 = vector.broadcast %75 : f32 to vector<8x1xf32>
    %77 = arith.mulf %73, %76 : vector<8x1xf32>
    %78 = arith.index_cast %71 : i32 to index
    %c0_39 = arith.constant 0 : index
    %c0_40 = arith.constant 0 : index
    %79 = vector.load %arg11[%78, %c0_39, %c0_40] : memref<4x8x16xf32, #tpu.memory_space<vmem>>, vector<1x8x16xf32>
    %80 = vector.shape_cast %79 : vector<1x8x16xf32> to vector<8x16xf32>
    %81 = vector.broadcast %77 : vector<8x1xf32> to vector<8x16xf32>
    %82 = arith.mulf %80, %81 : vector<8x16xf32>
    %83 = arith.addf %63, %82 : vector<8x16xf32>
    %c1_i32_41 = arith.constant 1 : i32
    %84 = arith.muli %arg1, %c1_i32_41 : i32
    %c2_i32_42 = arith.constant 2 : i32
    %85 = arith.subi %84, %c2_i32_42 : i32
    %c4_i32_43 = arith.constant 4 : i32
    %86 = arith.addi %85, %c4_i32_43 : i32
    %c0_i32_44 = arith.constant 0 : i32
    %87 = arith.cmpi sge, %86, %c0_i32_44 : i32
    %c4_i32_45 = arith.constant 4 : i32
    %88 = arith.cmpi slt, %86, %c4_i32_45 : i32
    %89 = arith.andi %87, %88 : i1
    %c0_i32_46 = arith.constant 0 : i32
    %c3_i32_47 = arith.constant 3 : i32
    %90 = arith.maxsi %c0_i32_46, %86 : i32
    %91 = arith.minsi %c3_i32_47, %90 : i32
    %c4 = arith.constant 4 : index
    %c0_48 = arith.constant 0 : index
    %c0_49 = arith.constant 0 : index
    %92 = vector.load %arg6[%c4, %c0_48, %c0_49] : memref<5x8x1xf32, #tpu.memory_space<vmem>>, vector<1x8x1xf32>
    %93 = vector.shape_cast %92 : vector<1x8x1xf32> to vector<8x1xf32>
    %94 = arith.extui %89 : i1 to i32
    %95 = arith.sitofp %94 : i32 to f32
    %96 = vector.broadcast %95 : f32 to vector<8x1xf32>
    %97 = arith.mulf %93, %96 : vector<8x1xf32>
    %98 = arith.index_cast %91 : i32 to index
    %c0_50 = arith.constant 0 : index
    %c0_51 = arith.constant 0 : index
    %99 = vector.load %arg11[%98, %c0_50, %c0_51] : memref<4x8x16xf32, #tpu.memory_space<vmem>>, vector<1x8x16xf32>
    %100 = vector.shape_cast %99 : vector<1x8x16xf32> to vector<8x16xf32>
    %101 = vector.broadcast %97 : vector<8x1xf32> to vector<8x16xf32>
    %102 = arith.mulf %100, %101 : vector<8x16xf32>
    %103 = arith.addf %83, %102 : vector<8x16xf32>
    %c0_52 = arith.constant 0 : index
    %c0_53 = arith.constant 0 : index
    %104 = vector.load %arg7[%c0_52, %c0_53] : memref<8x1xf32, #tpu.memory_space<vmem>>, vector<8x1xf32>
    %105 = vector.broadcast %104 : vector<8x1xf32> to vector<8x16xf32>
    %106 = arith.mulf %103, %105 : vector<8x16xf32>
    %c0_54 = arith.constant 0 : index
    %c0_55 = arith.constant 0 : index
    %107 = vector.load %arg8[%c0_54, %c0_55] : memref<8x1xf32, #tpu.memory_space<vmem>>, vector<8x1xf32>
    %108 = vector.broadcast %107 : vector<8x1xf32> to vector<8x16xf32>
    %109 = arith.addf %106, %108 : vector<8x16xf32>
    %cst_56 = arith.constant 0.000000e+00 : f32
    %110 = vector.broadcast %cst_56 : f32 to vector<8x16xf32>
    %111 = arith.maximumf %109, %110 : vector<8x16xf32>
    %c0_57 = arith.constant 0 : index
    %c0_58 = arith.constant 0 : index
    %112 = vector.load %arg9[%c0_57, %c0_58] : memref<3x16xf32, #tpu.memory_space<vmem>>, vector<1x16xf32>
    %c1_59 = arith.constant 1 : index
    %c0_60 = arith.constant 0 : index
    %113 = vector.load %arg9[%c1_59, %c0_60] : memref<3x16xf32, #tpu.memory_space<vmem>>, vector<1x16xf32>
    %c2_61 = arith.constant 2 : index
    %c0_62 = arith.constant 0 : index
    %114 = vector.load %arg9[%c2_61, %c0_62] : memref<3x16xf32, #tpu.memory_space<vmem>>, vector<1x16xf32>
    %115 = vector.extract_strided_slice %111 {offsets = [0, 2], sizes = [8, 14], strides = [1, 1]} : vector<8x16xf32> to vector<8x14xf32>
    %cst_63 = arith.constant 0.000000e+00 : f32
    %116 = vector.broadcast %cst_63 : f32 to vector<8x2xf32>
    %117 = tpu.concatenate %115, %116 in 1 : vector<8x14xf32>, vector<8x2xf32> -> vector<8x16xf32>
    %118 = vector.broadcast %112 : vector<1x16xf32> to vector<8x16xf32>
    %119 = arith.mulf %117, %118 : vector<8x16xf32>
    %120 = vector.extract_strided_slice %111 {offsets = [0, 1], sizes = [8, 15], strides = [1, 1]} : vector<8x16xf32> to vector<8x15xf32>
    %cst_64 = arith.constant 0.000000e+00 : f32
    %121 = vector.broadcast %cst_64 : f32 to vector<8x1xf32>
    %122 = tpu.concatenate %120, %121 in 1 : vector<8x15xf32>, vector<8x1xf32> -> vector<8x16xf32>
    %123 = vector.broadcast %113 : vector<1x16xf32> to vector<8x16xf32>
    %124 = arith.mulf %122, %123 : vector<8x16xf32>
    %125 = arith.maximumf %119, %124 : vector<8x16xf32>
    %126 = arith.maximumf %111, %125 : vector<8x16xf32>
    %127 = vector.extract_strided_slice %126 {offsets = [0, 8], sizes = [8, 8], strides = [1, 1]} : vector<8x16xf32> to vector<8x8xf32>
    %cst_65 = arith.constant 0.000000e+00 : f32
    %128 = vector.broadcast %cst_65 : f32 to vector<8x8xf32>
    %129 = tpu.concatenate %127, %128 in 1 : vector<8x8xf32>, vector<8x8xf32> -> vector<8x16xf32>
    %130 = vector.extract_strided_slice %126 {offsets = [0, 4], sizes = [8, 12], strides = [1, 1]} : vector<8x16xf32> to vector<8x12xf32>
    %cst_66 = arith.constant 0.000000e+00 : f32
    %131 = vector.broadcast %cst_66 : f32 to vector<8x4xf32>
    %132 = tpu.concatenate %130, %131 in 1 : vector<8x12xf32>, vector<8x4xf32> -> vector<8x16xf32>
    %133 = vector.broadcast %114 : vector<1x16xf32> to vector<8x16xf32>
    %134 = arith.mulf %132, %133 : vector<8x16xf32>
    %135 = arith.maximumf %129, %134 : vector<8x16xf32>
    %136 = arith.maximumf %126, %135 : vector<8x16xf32>
    %137 = vector.extract_strided_slice %136 {offsets = [0, 0], sizes = [8, 8], strides = [1, 1]} : vector<8x16xf32> to vector<8x8xf32>
    %cst_67 = arith.constant 0.000000e+00 : f32
    %138 = vector.broadcast %cst_67 : f32 to vector<8x120xf32>
    %139 = tpu.concatenate %137, %138 in 1 : vector<8x8xf32>, vector<8x120xf32> -> vector<8x128xf32>
    %c0_68 = arith.constant 0 : index
    %c0_69 = arith.constant 0 : index
    %c0_70 = arith.constant 0 : index
    %140 = vector.load %arg10[%c0_68, %c0_69, %c0_70] : memref<1x8x128xf32, #tpu.memory_space<vmem>>, vector<1x8x128xf32>
    %141 = vector.shape_cast %140 : vector<1x8x128xf32> to vector<8x128xf32>
    %142 = vector.shape_cast %139 : vector<8x128xf32> to vector<1x8x128xf32>
    tpu.vector_store %arg10[%c0_68, %c0_69, %c0_70], %142 {strides = array<i32>} : memref<1x8x128xf32, #tpu.memory_space<vmem>>, vector<1x8x128xf32>,
    return
  }
  func.func @transform_0(%arg0: i32, %arg1: i32) -> (i32, i32, i32, i32) {
    %c0_i32 = arith.constant 0 : i32
    %c0_i32_0 = arith.constant 0 : i32
    %c0_i32_1 = arith.constant 0 : i32
    %c0_i32_2 = arith.constant 0 : i32
    return %arg0, %c0_i32, %c0_i32_0, %c0_i32_1 : i32, i32, i32, i32
  }
  func.func @transform_1(%arg0: i32, %arg1: i32) -> (i32, i32) {
    %c0_i32 = arith.constant 0 : i32
    %c0_i32_0 = arith.constant 0 : i32
    %c0_i32_1 = arith.constant 0 : i32
    return %c0_i32, %c0_i32_0 : i32, i32
  }
  func.func @transform_2(%arg0: i32, %arg1: i32) -> (i32, i32) {
    %c0_i32 = arith.constant 0 : i32
    %c0_i32_0 = arith.constant 0 : i32
    %c0_i32_1 = arith.constant 0 : i32
    return %c0_i32, %c0_i32_0 : i32, i32
  }
  func.func @transform_3(%arg0: i32, %arg1: i32) -> (i32, i32) {
    %c0_i32 = arith.constant 0 : i32
    %c0_i32_0 = arith.constant 0 : i32
    %c0_i32_1 = arith.constant 0 : i32
    return %c0_i32, %c0_i32_0 : i32, i32
  }
  func.func @transform_4(%arg0: i32, %arg1: i32) -> (i32, i32, i32) {
    %c0_i32 = arith.constant 0 : i32
    %c0_i32_0 = arith.constant 0 : i32
    %c0_i32_1 = arith.constant 0 : i32
    %c0_i32_2 = arith.constant 0 : i32
    return %c0_i32, %c0_i32_0, %c0_i32_1 : i32, i32, i32
  }
  func.func @transform_5(%arg0: i32, %arg1: i32) -> (i32, i32) {
    %c0_i32 = arith.constant 0 : i32
    %c0_i32_0 = arith.constant 0 : i32
    %c0_i32_1 = arith.constant 0 : i32
    return %c0_i32, %c0_i32_0 : i32, i32
  }
  func.func @transform_6(%arg0: i32, %arg1: i32) -> (i32, i32) {
    %c0_i32 = arith.constant 0 : i32
    %c0_i32_0 = arith.constant 0 : i32
    %c0_i32_1 = arith.constant 0 : i32
    return %c0_i32, %c0_i32_0 : i32, i32
  }
  func.func @transform_7(%arg0: i32, %arg1: i32) -> (i32, i32) {
    %c0_i32 = arith.constant 0 : i32
    %c0_i32_0 = arith.constant 0 : i32
    %c0_i32_1 = arith.constant 0 : i32
    return %c0_i32, %c0_i32_0 : i32, i32
  }
  func.func @transform_8(%arg0: i32, %arg1: i32) -> (i32, i32, i32) {
    %c0_i32 = arith.constant 0 : i32
    %c0_i32_0 = arith.constant 0 : i32
    return %arg0, %c0_i32, %arg1 : i32, i32, i32
  }
}

</mosaic_0001>

<bundles_post_ra>
// kernel: _lambda_.1
= control target key start
LH: loop header
LB: loop body
LE: loop exit
PB: predicated region body
PF: predicated region fallthrough
CT: control target
= control target key end

     0   :  { %s1296_s27 = smov 0   ;;  %s1298_s28 = smov 0   ;;  %s1468_s0 = inlined_call_operand.vmem [shape: f32[2,4,27,16], index: 0, kind: input, shape index: {}]   ;;  %s1469_s1 = inlined_call_operand.vmem [shape: f32[8,27], index: 1, kind: input, shape index: {}]   ;;  %s1470_s2 = inlined_call_operand.vmem [shape: f32[8,1], index: 2, kind: input, shape index: {}]   ;;  %s1471_s3 = inlined_call_operand.vmem [shape: f32[8,1], index: 3, kind: input, shape index: {}]   ;;  %s1472_s4 = inlined_call_operand.vmem [shape: f32[5,8,1], index: 4, kind: input, shape index: {}]   ;;  %s1473_s5 = inlined_call_operand.vmem [shape: f32[8,1], index: 5, kind: input, shape index: {}]   ;;  %s1474_s6 = inlined_call_operand.vmem [shape: f32[8,1], index: 6, kind: input, shape index: {}]   ;;  %s1475_s7 = inlined_call_operand.vmem [shape: f32[3,16], index: 7, kind: input, shape index: {}]   ;;  %s1476_s8 = inlined_call_operand.vmem [shape: f32[2,8,512], index: 8, kind: output, shape index: {}]  }
   0x1   :  { %s1300_s29 = smov 0   ;;  %s1302_s30 = smov 0  }
   0x2   :  { %s1304_s9 = smov 0  }
   0x3 LB: > { %s27_s10 = sadd.s32 1, %s1233_s29  ;;  %s30_s11 = sadd.s32 1, %s1237_s30  ;;  %s1241_s9 = sphi %s1304_s9, %s18_s9   ;;  %s1237_s30 = sphi %s1302_s30, %s1480_s30   ;;  %s1233_s29 = sphi %s1300_s29, %s1479_s29   ;;  %s1229_s28 = sphi %s1298_s28, %s1478_s28   ;;  %s1225_s27 = sphi %s1296_s27, %s1477_s27  }
   0x4   : > { %p28_p0 = scmp.ge.s32.totalorder %s27_s10, 4  ;;  %p1005_p1 = scmp.ge.s32.totalorder %s1241_s9, 1 }
   0x5   : > { %p276_p2 = scmp.lt.s32.totalorder %s1241_s9, 9 }
   0x6   : > { %s1482_s10 = smov (%p28_p0, %s27_s10), 0  ;;  %s1484_s11 = smov (!%p28_p0, %s30_s11), %s1237_s30 }
   0x7   : > { %p277_p3 = pnand %p1005_p1, %p276_p2  ;;  %p32_p4 = scmp.ge.s32.totalorder %s1484_s11, 2 }
   0x8   : > { %p313_p5 = scmp.lt.s32.totalorder (!%p277_p3), %s1229_s28, 1  ;;  %p320_p6 = scmp.lt.s32.totalorder (!%p277_p3), %s1225_s27, 3 }
   0x9   : > { %s1486_s11 = smov (%p32_p4, %s1484_s11), 0  ;;  %280 = sbr.rel (%p277_p3) target bundleno = 649 (0x289), region = 52 }
   0xa   : > { %p1010_p7 = scmp.ne.s32.totalorder (!%p277_p3), %s1225_s27, 0 }
   0xe   : > { %s1488_s28 = smov (!%p313_p5, %s1229_s28), 1 }
   0xf   : > { %s321_s12 = scalar_select %p320_p6, %s1225_s27, 3 }
  0x10   : > { %s1076_s13 = sshll.u32 %s1488_s28, 7  ;;  %s1008_s14 = sshll.u32 %s1488_s28, 2 }
  0x11   : > { %s1335_s17 = scalar_lea.vmem %s1468_s0, %s1076_s13  ;;  %s323_s18 = sadd.s32 %s1008_s14, %s321_s12 }
  0x12   : > { %s1009_s19 = sshll.u32 %s323_s18, 3  ;;  %329 = sbr.rel (%p1010_p7) target bundleno = 243 (0xf3), region = 56 }
  0x13   : > { %s1340_s22 = scalar_lea.vmem %s1476_s8, %s1009_s19 }
  0x17   : > { %v333_v0 = vld [vmem:[%s1335_s17 + $0x18] sm:$0x7]  ;;  %vm339_vm0 = vcmask 1042432   ;;  %v1243_v2 = vmov 0.0   ;;  %v332_v3 = vld [vmem:[%s1335_s17 + $0x10] sm:$0xff]  ;;  %v331_v5 = vld [vmem:[%s1335_s17 + $0x8] sm:$0xff] }
  0x18   : > { %v1016_v1 = vld [vmem:[%s1335_s17 + $0x38] sm:$0x7]  ;;  %1107 = vmatprep.subr.mxu0 %v1243_v2  ;;  %1118 = vmatprep.subr.mxu1 %v1243_v2  ;;  %v1015_v4 = vld [vmem:[%s1335_s17 + $0x30] sm:$0xff]  ;;  %v1014_v6 = vld [vmem:[%s1335_s17 + $0x28] sm:$0xff]  ;;  %vm335_vm1 = vcmask 220160   ;;  %vm1244_vm2 = vmmov 0  }
  0x19   : > { %1108 = vmatpush3.msk.msra.mxu0 %vm339_vm0, %v333_v0  ;;  %1119 = vmatpush3.msk.msra.mxu1 %vm339_vm0, %v1016_v1  ;;  %v330_v7 = vld [vmem:[%s1335_s17] sm:$0xff]  ;;  %v1022_v10 = vld [vmem:[%s1335_s17 + $0x58] sm:$0x7]  ;;  %v1021_v12 = vld [vmem:[%s1335_s17 + $0x50] sm:$0xff]  ;;  %v1245_v19 = vmov 0   ;;  %vm428_vm3 = vcmask 130048  }
  0x1a   : > { %1109 = vmatprep.subr.mxu0 %v1243_v2  ;;  %1120 = vmatprep.subr.mxu1 %v1243_v2  ;;  %v1013_v8 = vld [vmem:[%s1335_s17 + $0x20] sm:$0xff]  ;;  %v1028_v11 = vld [vmem:[%s1335_s17 + $0x78] sm:$0x7]  ;;  %v1027_v13 = vld [vmem:[%s1335_s17 + $0x70] sm:$0xff] }
  0x1b   : > { %1110 = vmatpush3.msra.mxu0 %v332_v3  ;;  %1121 = vmatpush3.msra.mxu1 %v1015_v4  ;;  %v334_v9 = vld [vmem:[%s1469_s1] sm:$0xff]  ;;  %v1020_v14 = vld [vmem:[%s1335_s17 + $0x48] sm:$0xff] }
  0x1c   : > { %1111 = vmatprep.subr.mxu0 %v1243_v2  ;;  %1122 = vmatprep.subr.mxu1 %v1243_v2  ;;  %v1026_v15 = vld [vmem:[%s1335_s17 + $0x68] sm:$0xff]  ;;  %v1019_v16 = vld [vmem:[%s1335_s17 + $0x40] sm:$0xff] }
  0x1d   : > { %1112 = vmatpush3.msra.mxu0 %v331_v5  ;;  %1123 = vmatpush3.msra.mxu1 %v1014_v6  ;;  %v1025_v17 = vld [vmem:[%s1335_s17 + $0x60] sm:$0xff] }
  0x1e   : > { %1113 = vmatprep.subr.mxu0 %v1243_v2  ;;  %1124 = vmatprep.subr.mxu1 %v1243_v2  ;;  %v611_v18 = vld [vmem:[%s1470_s2] sm:$0xff] }
  0x1f   : > { %1114 = vmatpush3.msra.mxu0 %v330_v7  ;;  %1115 = vmatprep.mubr.msk.f32.mxu0 %vm1244_vm2, %v1243_v2  ;;  %v519_v20 = vld [vmem:[%s1471_s3] sm:$0xff] }
  0x20   : > { %1125 = vmatpush3.msra.mxu1 %v1013_v8  ;;  %1126 = vmatprep.mubr.msk.f32.mxu1 %vm1244_vm2, %v1243_v2 }
  0x21   : > { %1116 = vmatmul.mubr.msk.f32.vlgmr.msra.gmra.mxu0 %vm335_vm1, %v334_v9  ;;  %1127 = vmatmul.mubr.msk.f32.vlgmr.msra.gmra.mxu1 %vm335_vm1, %v334_v9 }
  0x22   : > { %1129 = vmatprep.subr.mxu0 %v1243_v2  ;;  %1140 = vmatprep.subr.mxu1 %v1243_v2 }
  0x23   : > { %1130 = vmatpush3.msk.msra.mxu0 %vm339_vm0, %v1022_v10  ;;  %1141 = vmatpush3.msk.msra.mxu1 %vm339_vm0, %v1028_v11 }
  0x24   : > { %1131 = vmatprep.subr.mxu0 %v1243_v2  ;;  %1142 = vmatprep.subr.mxu1 %v1243_v2 }
  0x25   : > { %1132 = vmatpush3.msra.mxu0 %v1021_v12  ;;  %1143 = vmatpush3.msra.mxu1 %v1027_v13 }
  0x26   : > { %1133 = vmatprep.subr.mxu0 %v1243_v2  ;;  %1144 = vmatprep.subr.mxu1 %v1243_v2 }
  0x27   : > { %1134 = vmatpush3.msra.mxu0 %v1020_v14  ;;  %1145 = vmatpush3.msra.mxu1 %v1026_v15 }
  0x28   : > { %1135 = vmatprep.subr.mxu0 %v1243_v2  ;;  %1146 = vmatprep.subr.mxu1 %v1243_v2 }
  0x29   : > { %1136 = vmatpush3.msra.mxu0 %v1019_v16  ;;  %1137 = vmatprep.mubr.msk.f32.mxu0 %vm1244_vm2, %v1243_v2 }
  0x2a   : > { %1147 = vmatpush3.msra.mxu1 %v1025_v17  ;;  %1148 = vmatprep.mubr.msk.f32.mxu1 %vm1244_vm2, %v1243_v2 }
  0x2b   : > { %1138 = vmatmul.mubr.msk.f32.vlgmr.msra.gmra.mxu0 %vm335_vm1, %v334_v9  ;;  %1149 = vmatmul.mubr.msk.f32.vlgmr.msra.gmra.mxu1 %vm335_vm1, %v334_v9 }
  0x2c   : > { %1200 = vset.pattern.permute.xlu1 %v1245_v19  ;;  %1199 = vset.pattern.permute.xlu0 %v1245_v19 }
  0x2d   : > { %614 = vperm.xlu1 %1200, %v611_v18   ;;  %416 = vperm.xlu0 %1199, %v611_v18  }
  0x31   : > { %713 = vperm.xlu1 %1200, %v611_v18   ;;  %515 = vperm.xlu0 %1199, %v611_v18  }
  0x35   : > { %522 = vperm.xlu1 %1200, %v519_v20   ;;  %423 = vperm.xlu0 %1199, %v519_v20  }
  0x39   : > { %720 = vperm.xlu1 %1200, %v519_v20   ;;  %621 = vperm.xlu0 %1199, %v519_v20  }
  0xa8   : > { %v615_v21 = vpop.permute.xlu1 %614  ;;  %v417_v22 = vpop.permute.xlu0 %416 }
  0xac   : > { %v714_v23 = vpop.permute.xlu1 %713  ;;  %v516_v24 = vpop.permute.xlu0 %515 }
  0xb0   : > { %v523_v27 = vpop.permute.xlu1 %522  ;;  %v424_v28 = vpop.permute.xlu0 %423 }
  0xb4   : > { %v721_v39 = vpop.permute.xlu1 %720  ;;  %v622_v40 = vpop.permute.xlu0 %621 }
  0xe1   : > { %v409_v25 = vpop.f32.mrf.mxu0  ;;  %v508_v26 = vpop.f32.mrf.mxu1 }
  0xe2   : > { %v419_v29 = vmul.f32 %v417_v22, %v409_v25  ;;  %v518_v30 = vmul.f32 %v516_v24, %v508_v26 }
  0xe3   : > { %v1117_v31 = vpop.f32.mrf.mxu0  ;;  %v1128_v32 = vpop.f32.mrf.mxu1 }
  0xe4   : > { %v426_v33 = vadd.f32 %v424_v28, %v419_v29  ;;  %v525_v34 = vadd.f32 %v523_v27, %v518_v30 }
  0xe6   : > { %v427_v35 = vmax.f32 %v426_v33, 0.0  ;;  %v526_v36 = vmax.f32 %v525_v34, 0.0 }
  0xe8   : > { %429 = vst.msk [vmem:[#allocation2] sm:$0xff] %vm428_vm3, %v427_v35  ;;  %528 = vst.msk [vmem:[#allocation2 + $0x8] sm:$0xff] %vm428_vm3, %v526_v36 }
  0xeb   : > { %v607_v37 = vpop.f32.mrf.mxu0  ;;  %v706_v38 = vpop.f32.mrf.mxu1 }
  0xec   : > { %v617_v41 = vmul.f32 %v615_v21, %v607_v37  ;;  %v716_v42 = vmul.f32 %v714_v23, %v706_v38 }
  0xed   : > { %v1139_v43 = vpop.f32.mrf.mxu0  ;;  %v1150_v44 = vpop.f32.mrf.mxu1 }
  0xee   : > { %v624_v45 = vadd.f32 %v622_v40, %v617_v41  ;;  %v723_v46 = vadd.f32 %v721_v39, %v716_v42 }
  0xf0   : > { %v625_v47 = vmax.f32 %v624_v45, 0.0  ;;  %v724_v48 = vmax.f32 %v723_v46, 0.0 }
  0xf2   : > { %627 = vst.msk [vmem:[#allocation2 + $0x10] sm:$0xff] %vm428_vm3, %v625_v47  ;;  %726 = vst.msk [vmem:[#allocation2 + $0x18] sm:$0xff] %vm428_vm3, %v724_v48 }
  0xf3 PF: > { %p776_p8 = scmp.ge.s32.totalorder %s1225_s27, 0  ;;  %p777_p9 = scmp.lt.s32.totalorder %s1225_s27, 4  ;;  %v1246_v49 = vmov 0   ;;  %v1052_v50 = vld [vmem:[%s1472_s4 + $0x10] sm:$0xff]  ;;  %v736_v53 = vld [vmem:[%s1472_s4] sm:$0xff]  ;;  %v1060_v56 = vld [vmem:[%s1472_s4 + $0x18] sm:$0xff] }
  0xf4   : > { %1202 = vset.pattern.permute.xlu1 %v1246_v49  ;;  %1201 = vset.pattern.permute.xlu0 %v1246_v49  ;;  %s1387_s13 = sadd.s32 4294967294, %s1225_s27  ;;  %s1390_s14 = sadd.s32 1, %s1225_s27  ;;  %v1044_v59 = vld [vmem:[%s1472_s4 + $0x8] sm:$0xff]  ;;  %v850_v62 = vld [vmem:[%s1473_s5] sm:$0xff]  ;;  %vm882_vm4 = vcmask 121856   ;;  %vm872_vm5 = vcmask 113664  }
  0xf5   : > { %p778_p10 = pnand %p777_p9, %p776_p8  ;;  %p728_p11 = scmp.ge.s32.totalorder %s1387_s13, 0  ;;  %v1068_v63 = vld [vmem:[%s1472_s4 + $0x20] sm:$0xff]  ;;  %vm900_vm6 = vcmask 97280   ;;  %vm895_vm7 = vcmask 64512  }
  0xf6   : > { %p729_p12 = scmp.lt.s32.totalorder %s1387_s13, 4  ;;  %p801_p13 = scmp.ge.s32.totalorder %s1390_s14, 0  ;;  %v857_v2 = vld [vmem:[%s1474_s6] sm:$0xff] }
  0xf7   : > { %s1053_s15 = scalar_select %p778_p10, 0, 1  ;;  %v1072_v27 = vld [vmem:[%s1475_s7 + $0x1] ss:$0 sm:$0xff]  ;;  %v1071_v28 = vld [vmem:[%s1475_s7] ss:$0 sm:$0xff] }
  0xf8   : > { %p730_p0 = pnand %p729_p12, %p728_p11  ;;  %p802_p1 = scmp.lt.s32.totalorder %s1390_s14, 4  ;;  %v1073_v37 = vld [vmem:[%s1475_s7 + $0x2] ss:$0 sm:$0xff] }
  0xf9   : > { %s787_s18 = scvt.s32.f32 %s1053_s15  ;;  %s1400_s19 = sadd.s32 4294967295, %s1225_s27 }
  0xfa   : > { %s1037_s20 = scalar_select %p730_p0, 0, 1 }
  0xfb   : > { %v788_v51 = vstv %s787_s18  ;;  %p803_p2 = pnand %p802_p1, %p801_p13  ;;  %p752_p3 = scmp.ge.s32.totalorder %s1400_s19, 0 }
  0xfc   : > { %v789_v52 = vmul.f32 %v1052_v50, %v788_v51  ;;  %s738_s24 = scvt.s32.f32 %s1037_s20  ;;  %p753_p4 = scmp.lt.s32.totalorder %s1400_s19, 4 }
  0xfd   : > { %s1061_s25 = scalar_select %p803_p2, 0, 1 }
  0xfe   : > { %795 = vperm.xlu1 %1202, %v789_v52   ;;  %v739_v54 = vstv %s738_s24  ;;  %p754_p5 = pnand %p753_p4, %p752_p3  ;;  %s1408_s26 = sadd.s32 2, %s1225_s27 }
  0xff   : > { %v740_v55 = vmul.f32 %v739_v54, %v736_v53  ;;  %s812_s15 = scvt.s32.f32 %s1061_s25  ;;  %p826_p7 = scmp.ge.s32.totalorder %s1408_s26, 0 }
 0x100   : > { %s1045_s16 = scalar_select %p754_p5, 0, 1 }
 0x101   : > { %746 = vperm.xlu0 %1201, %v740_v55   ;;  %v813_v57 = vstv %s812_s15  ;;  %p827_p8 = scmp.lt.s32.totalorder %s1408_s26, 4  ;;  %p780_p10 = scmp.gt.s32.totalorder %s1225_s27, 0 }
 0x102   : > { %v814_v58 = vmul.f32 %v1060_v56, %v813_v57  ;;  %s763_s20 = scvt.s32.f32 %s1045_s16  ;;  %p732_p11 = scmp.gt.s32.totalorder %s1387_s13, 0 }
 0x103   : > { %p828_p9 = pnand %p827_p8, %p826_p7  ;;  %p756_p12 = scmp.gt.s32.totalorder %s1400_s19, 0 }
 0x104   : > { %820 = vperm.xlu1 %1202, %v814_v58   ;;  %v764_v60 = vstv %s763_s20  ;;  %s781_s17 = scalar_select %p780_p10, %s1225_s27, 0 }
 0x105   : > { %v765_v61 = vmul.f32 %v1044_v59, %v764_v60  ;;  %s1069_s24 = scalar_select %p828_p9, 0, 1 }
 0x106   : > { %s1490_s17 = smov (!%p320_p6, %s781_s17), 3  ;;  %p805_p13 = scmp.gt.s32.totalorder %s1390_s14, 0 }
 0x107   : > { %771 = vperm.xlu0 %1201, %v765_v61   ;;  %s837_s12 = scvt.s32.f32 %s1069_s24  ;;  %p1032_p0 = scmp.lt.s32.totalorder %s1387_s13, 3 }
 0x108   : > { %853 = vperm.xlu1 %1202, %v850_v62   ;;  %s733_s18 = scalar_select %p732_p11, %s1387_s13, 0 }
 0x109   : > { %v838_v0 = vstv %s837_s12  ;;  %p1039_p1 = scmp.lt.s32.totalorder %s1400_s19, 3  ;;  %s1492_s19 = smov (!%p756_p12, %s1400_s19), 0 }
 0x10a   : > { %v839_v1 = vmul.f32 %v1068_v63, %v838_v0  ;;  %p1055_p2 = scmp.lt.s32.totalorder %s1390_s14, 3  ;;  %p830_p3 = scmp.gt.s32.totalorder %s1408_s26, 0 }
 0x10b   : > { %s1494_s14 = smov (!%p805_p13, %s1390_s14), 0  ;;  %s1496_s18 = smov (!%p1032_p0, %s733_s18), 3 }
 0x10c   : > { %845 = vperm.xlu0 %1201, %v839_v1   ;;  %s1498_s19 = smov (!%p1039_p1, %s1492_s19), 3  ;;  %p1063_p4 = scmp.lt.s32.totalorder %s1408_s26, 3 }
 0x10d   : > { %s831_s20 = scalar_select %p830_p3, %s1408_s26, 0 }
 0x10e   : > { %s1500_s14 = smov (!%p1055_p2, %s1494_s14), 3  ;;  %s1038_s21 = sshll.u32 %s1496_s18, 3 }
 0x10f   : > { %s1046_s23 = sshll.u32 %s1498_s19, 3  ;;  %s1054_s24 = sshll.u32 %s1490_s17, 3 }
 0x110   : > { %860 = vperm.xlu0 %1201, %v857_v2   ;;  %s1502_s20 = smov (!%p1063_p4, %s831_s20), 3  ;;  %s1062_s27 = sshll.u32 %s1500_s14, 3 }
 0x111   : > { %s742_s25 = scalar_lea.vmem [#allocation2], %s1038_s21  ;;  %s767_s13 = scalar_lea.vmem [#allocation2], %s1046_s23 }
 0x112   : > { %v743_v5 = vld [vmem:[%s742_s25] sm:$0xff]  ;;  %s1070_s28 = sshll.u32 %s1502_s20, 3  ;;  %s791_s12 = scalar_lea.vmem [#allocation2], %s1054_s24 }
 0x113   : > { %v768_v6 = vld [vmem:[%s767_s13] sm:$0xff]  ;;  %s816_s15 = scalar_lea.vmem [#allocation2], %s1062_s27  ;;  %s841_s19 = scalar_lea.vmem [#allocation2], %s1070_s28 }
 0x114   : > { %v792_v7 = vld [vmem:[%s791_s12] sm:$0xff]  ;;  %s1247_s14 = smov 127   ;;  %s1248_s26 = smov 126  }
 0x115   : > { %v817_v11 = vld [vmem:[%s816_s15] sm:$0xff]  ;;  %s1249_s21 = smov 120   ;;  %s1250_s23 = smov 124  }
 0x116   : > { %v842_v15 = vld [vmem:[%s841_s19] sm:$0xff] }
 0x179   : > { %v796_v4 = vpop.permute.xlu1 %795 }
 0x17a   : > { %v798_v13 = vmul.f32 %v796_v4, %v792_v7 }
 0x17c   : > { %v747_v3 = vpop.permute.xlu0 %746 }
 0x17d   : > { %v749_v9 = vmul.f32 %v747_v3, %v743_v5 }
 0x17f   : > { %v821_v12 = vpop.permute.xlu1 %820 }
 0x180   : > { %v823_v16 = vmul.f32 %v821_v12, %v817_v11 }
 0x182   : > { %v772_v8 = vpop.permute.xlu0 %771 }
 0x183   : > { %v774_v10 = vmul.f32 %v772_v8, %v768_v6  ;;  %v854_v22 = vpop.permute.xlu1 %853 }
 0x185   : > { %v775_v14 = vadd.f32 %v774_v10, %v749_v9 }
 0x187   : > { %v799_v17 = vadd.f32 %v798_v13, %v775_v14  ;;  %v846_v18 = vpop.permute.xlu0 %845 }
 0x188   : > { %v848_v20 = vmul.f32 %v846_v18, %v842_v15 }
 0x189   : > { %v824_v19 = vadd.f32 %v823_v16, %v799_v17 }
 0x18b   : > { %v849_v21 = vadd.f32 %v848_v20, %v824_v19  ;;  %v861_v24 = vpop.permute.xlu0 %860 }
 0x18d   : > { %v856_v23 = vmul.f32 %v854_v22, %v849_v21 }
 0x18f   : > { %v863_v25 = vadd.f32 %v861_v24, %v856_v23 }
 0x191   : > { %v864_v26 = vmax.f32 %v863_v25, 0.0 }
 0x193   : > { %879 = vrot.lane.b32.xlu0 %v864_v26, %s1247_s14  ;;  %869 = vrot.lane.b32.xlu1 %v864_v26, %s1248_s26 }
 0x205   : > { %v880_v29 = vpop.permute.xlu0 %879  ;;  %v870_v30 = vpop.permute.xlu1 %869 }
 0x206   : > { %v883_v31 = vsel %vm882_vm4, %v880_v29, 0.0  ;;  %v873_v32 = vsel %vm872_vm5, %v870_v30, 0.0 }
 0x207   : > { %v888_v33 = vmul.f32 %v1072_v27, %v883_v31  ;;  %v878_v34 = vmul.f32 %v1071_v28, %v873_v32 }
 0x209   : > { %v889_v35 = vmax.f32 %v878_v34, %v888_v33 }
 0x20b   : > { %v890_v36 = vmax.f32 %v864_v26, %v889_v35 }
 0x20d   : > { %892 = vrot.lane.b32.xlu0 %v890_v36, %s1249_s21  ;;  %897 = vrot.lane.b32.xlu1 %v890_v36, %s1250_s23 }
 0x27f   : > { %v893_v38 = vpop.permute.xlu0 %892  ;;  %v898_v39 = vpop.permute.xlu1 %897 }
 0x280   : > { %v901_v40 = vsel %vm900_vm6, %v898_v39, 0.0  ;;  %v896_v42 = vsel %vm895_vm7, %v893_v38, 0.0 }
 0x281   : > { %v906_v41 = vmul.f32 %v1073_v37, %v901_v40 }
 0x283   : > { %v907_v43 = vmax.f32 %v896_v42, %v906_v41 }
 0x285   : > { %v908_v44 = vmax.f32 %v890_v36, %v907_v43 }
 0x287   : > { %v909_v45 = vsel %vm895_vm7, %v908_v44, 0.0 }
 0x288   : > { %910 = vst [vmem:[%s1340_s22] sm:$0xff] %v909_v45 }
 0x289 PF: > { %s18_s9 = sadd.s32 1, %s1241_s9   ;;  %s1477_s27 = smov %s1233_s29 }
 0x28a   : > { %p15_p6 = scmp.ge.s32.totalorder %s18_s9, 10   ;;  %s1478_s28 = smov %s1237_s30 }
 0x28b   : > { %s1479_s29 = smov %s1482_s10  ;;  %s1480_s30 = smov %s1486_s11 }
 0x28c   :  { %17 = sbr.rel (!%p15_p6) target bundleno = 3 (0x3), region = 101 }

</bundles_post_ra>
